<compile_context>
chip_gen: v5e
topology: v5e:2x2
jax: 0.10.0
libtpu: 0.0.40
codegen_flags: <defaults>
</compile_context>

<pallas_src>
import jax
import jax.numpy as jnp
from jax.experimental import pallas as pl
from jax.experimental.pallas import tpu as pltpu

_MAX_TILE_N = 4096     # row-tile cap (double-buffered in+out tiles ~8 MiB of VMEM)
_MIN_SPLIT_TILE = 512  # below this many rows, splitting only adds per-step overhead


def _fused_affine_kernel(x_ref, w_ref, b_ref, o_ref):
    # One small MXU matmul ((tile_n, F) @ (F, C)) plus a VPU bias add; everything
    # is VMEM resident.  Weight/bias index_maps are constant, so they are DMA'd
    # once and stay pinned across grid steps.
    o_ref[...] = (
        jnp.dot(x_ref[...], w_ref[...], preferred_element_type=jnp.float32)
        + b_ref[...]
    ).astype(o_ref.dtype)


def _round_up(v, m):
    return -(-v // m) * m


def _vmem_tile_bytes(rows, cols, itemsize=4):
    # VMEM layout pads the last dim to 128 lanes, the second-to-last to 8 sublanes.
    return _round_up(max(rows, 1), 8) * _round_up(max(cols, 1), 128) * itemsize


def prepare_fused_params(params):
    """Fuse the 3 Linear layers into a single affine map (Wf, bf).

    params: [(W1, b1), (W2, b2), (W3, b3)], W_i stored as (in_features, out_features).
    Exact ONLY because BlobModel's Sequential has no activations between layers.
    Returns unpadded float32 (wf: (F, C), bf: (1, C)) -- tiny operands stay tiny.
    """
    (w1, b1), (w2, b2), (w3, b3) = params
    # Structural guard: shapes must chain as pure affine layers (no nonlinearity
    # can be expressed in this representation -- do NOT add one silently).
    assert w1.shape[1] == w2.shape[0] and w2.shape[1] == w3.shape[0], (
        "prepare_fused_params assumes three chained Linear layers with no "
        "intervening nonlinearity")
    wf = (w1 @ w2 @ w3).astype(jnp.float32)                              # (F, C)
    bf = ((b1 @ w2 + b2) @ w3 + b3).astype(jnp.float32).reshape(1, -1)   # (1, C)
    return wf, bf


@jax.jit
def blob_model_forward(x, wf, bf):
    """x: (N, F) float32, wf: (F, C), bf: (1, C)  ->  logits (N, C) float32."""
    n, f = x.shape
    f_w, c = wf.shape
    assert f == f_w, "feature dim mismatch between x and fused weight"

    # ---- row tiling (all static shape arithmetic, resolved at trace time) -----
    n_pad8 = max(8, _round_up(n, 8))
    if n_pad8 <= _MIN_SPLIT_TILE:
        tile_n = n_pad8                              # single grid step
    else:
        # Aim for >= 4 grid steps so the "parallel" axis can shard across v7x's
        # two TensorCores; clamp to [_MIN_SPLIT_TILE, _MAX_TILE_N], multiple of 8.
        tile_n = _round_up(-(-n_pad8 // 4), 8)
        tile_n = max(_MIN_SPLIT_TILE, min(_MAX_TILE_N, tile_n))
    n_pad = _round_up(n_pad8, tile_n)

    xp = x.astype(jnp.float32)
    if n_pad != n:
        xp = jnp.pad(xp, ((0, n_pad - n), (0, 0)))   # rows only; feature dim untouched

    grid = (n_pad // tile_n,)

    # Advisory cost from TRUE dims (F=2, C=4), not padded ones.
    cost = pl.CostEstimate(
        flops=2 * n * f * c,
        transcendentals=0,
        bytes_accessed=(n * f + f * c + c + n * c) * 4,
    )

    # Real VMEM footprint: double-buffered x/out tiles (lane-padded!) + resident
    # weight/bias (also double-buffered by the default pipeliner), with headroom
    # for Mosaic internal scratch.  Stays well under v7x's 64 MiB physical VMEM.
    footprint = (2 * _vmem_tile_bytes(tile_n, f)
                 + 2 * _vmem_tile_bytes(tile_n, c)
                 + 2 * _vmem_tile_bytes(f, c)
                 + 2 * _vmem_tile_bytes(1, c))
    vmem_limit = min(64 * 1024 * 1024, max(4 * 1024 * 1024, 2 * footprint))

    out_padded = pl.pallas_call(
        _fused_affine_kernel,
        out_shape=jax.ShapeDtypeStruct((n_pad, c), jnp.float32),
        grid=grid,
        in_specs=[
            pl.BlockSpec((tile_n, f), lambda i: (i, 0)),   # x rows (true F, no lane pad)
            pl.BlockSpec((f, c), lambda i: (0, 0)),        # fused weight (resident)
            pl.BlockSpec((1, c), lambda i: (0, 0)),        # fused bias (resident)
        ],
        out_specs=pl.BlockSpec((tile_n, c), lambda i: (i, 0)),  # narrow (N, C) logits
        compiler_params=pltpu.CompilerParams(
            dimension_semantics=("parallel",),
            vmem_limit_bytes=vmem_limit,
        ),
        cost_estimate=cost,
    )(xp, wf, bf)

    return out_padded[:n] if n_pad != n else out_padded


def init_blob_params(key, num_features=2, num_hidden_units=8, num_classes=4):
    """Deterministic PyTorch-style (uniform +/- 1/sqrt(fan_in)) init; weights
    stored as (in_features, out_features)."""
    dims = [(num_features, num_hidden_units),
            (num_hidden_units, num_hidden_units),
            (num_hidden_units, num_classes)]
    params = []
    for fan_in, fan_out in dims:
        key, kw, kb = jax.random.split(key, 3)
        bound = 1.0 / jnp.sqrt(fan_in)
        w = jax.random.uniform(kw, (fan_in, fan_out), jnp.float32, -bound, bound)
        b = jax.random.uniform(kb, (fan_out,), jnp.float32, -bound, bound)
        params.append((w, b))
    return params


if __name__ == "__main__":
    NUM_FEATURES = 2   # BlobData.NUM_FEATURES
    NUM_CLASSES = 4    # BlobData.NUM_CLASSES
    NUM_HIDDEN = 8     # num_hidden_units
    BATCH = 16

    key = jax.random.PRNGKey(0)
    key_x, key_p = jax.random.split(key)
    x = jax.random.normal(key_x, (BATCH, NUM_FEATURES), dtype=jnp.float32)
    params = init_blob_params(key_p, NUM_FEATURES, NUM_HIDDEN, NUM_CLASSES)

    # One-time affine fusion (hoisted out of the per-call forward path).
    wf, bf = prepare_fused_params(params)
    wf = jax.block_until_ready(wf)
    bf = jax.block_until_ready(bf)

    logits = blob_model_forward(x, wf, bf)
    logits = jax.block_until_ready(logits)

    # Pure-JAX reference of the unfused 3-layer forward (module semantics).
    (w1, b1), (w2, b2), (w3, b3) = params
    ref = ((x @ w1 + b1) @ w2 + b2) @ w3 + b3
    assert logits.shape == (BATCH, NUM_CLASSES)
    assert jnp.allclose(logits, ref, atol=1e-4, rtol=1e-4), (
        float(jnp.max(jnp.abs(logits - ref))))

    print("KERNEL_OK")
</pallas_src>

<mosaic_0001>
module attributes {stable_mosaic.version = 11 : i64} {
  func.func @_fused_affine_kernel(%arg0: i32, %arg1: memref<16x2xf32, #tpu.memory_space<vmem>>, %arg2: memref<2x4xf32, #tpu.memory_space<vmem>>, %arg3: memref<1x4xf32, #tpu.memory_space<vmem>>, %arg4: memref<16x4xf32, #tpu.memory_space<vmem>>) attributes {dimension_semantics = [#tpu.dimension_semantics<parallel>], iteration_bounds = array<i64: 1>, scalar_prefetch = 0 : i64, scratch_operands = 0 : i64, tpu.core_type = #tpu.core_type<tc>, window_params = [{transform_indices = @transform_0, window_bounds = array<i64: 16, 2>}, {pipeline_mode = #tpu.pipeline_mode<synchronous>, transform_indices = @transform_1, window_bounds = array<i64: 2, 4>}, {pipeline_mode = #tpu.pipeline_mode<synchronous>, transform_indices = @transform_2, window_bounds = array<i64: 1, 4>}, {transform_indices = @transform_3, window_bounds = array<i64: 16, 4>}]} {
    %c0 = arith.constant 0 : index
    %c0_0 = arith.constant 0 : index
    %0 = vector.load %arg1[%c0, %c0_0] : memref<16x2xf32, #tpu.memory_space<vmem>>, vector<16x2xf32>
    %c0_1 = arith.constant 0 : index
    %c0_2 = arith.constant 0 : index
    %1 = vector.load %arg2[%c0_1, %c0_2] : memref<2x4xf32, #tpu.memory_space<vmem>>, vector<2x4xf32>
    %cst = arith.constant dense<0.000000e+00> : vector<16x4xf32>
    %2 = tpu.matmul %0, %1, %cst {dimension_numbers = #tpu.dot_dimension_numbers<[1], [0], [0], [1], [0, 0, 1, 1], [], []>} : vector<16x2xf32>, vector<2x4xf32>, vector<16x4xf32> -> vector<16x4xf32>
    %c0_3 = arith.constant 0 : index
    %c0_4 = arith.constant 0 : index
    %3 = vector.load %arg3[%c0_3, %c0_4] : memref<1x4xf32, #tpu.memory_space<vmem>>, vector<1x4xf32>
    %4 = vector.broadcast %3 : vector<1x4xf32> to vector<16x4xf32>
    %5 = arith.addf %2, %4 : vector<16x4xf32>
    %c0_5 = arith.constant 0 : index
    %c0_6 = arith.constant 0 : index
    %6 = vector.load %arg4[%c0_5, %c0_6] : memref<16x4xf32, #tpu.memory_space<vmem>>, vector<16x4xf32>
    tpu.vector_store %arg4[%c0_5, %c0_6], %5 {strides = array<i32>} : memref<16x4xf32, #tpu.memory_space<vmem>>, vector<16x4xf32>,
    return
  }
  func.func @transform_0(%arg0: i32) -> (i32, i32) {
    %c0_i32 = arith.constant 0 : i32
    %c0_i32_0 = arith.constant 0 : i32
    return %arg0, %c0_i32 : i32, i32
  }
  func.func @transform_1(%arg0: i32) -> (i32, i32) {
    %c0_i32 = arith.constant 0 : i32
    %c0_i32_0 = arith.constant 0 : i32
    %c0_i32_1 = arith.constant 0 : i32
    return %c0_i32, %c0_i32_0 : i32, i32
  }
  func.func @transform_2(%arg0: i32) -> (i32, i32) {
    %c0_i32 = arith.constant 0 : i32
    %c0_i32_0 = arith.constant 0 : i32
    %c0_i32_1 = arith.constant 0 : i32
    return %c0_i32, %c0_i32_0 : i32, i32
  }
  func.func @transform_3(%arg0: i32) -> (i32, i32) {
    %c0_i32 = arith.constant 0 : i32
    %c0_i32_0 = arith.constant 0 : i32
    return %arg0, %c0_i32 : i32, i32
  }
}

</mosaic_0001>

<bundles_post_ra>
// kernel: blob_model_forward.1
= control target key start
LH: loop header
LB: loop body
LE: loop exit
PB: predicated region body
PF: predicated region fallthrough
CT: control target
= control target key end

     0   :  { %vm28_vm0 = vcmask 1041408   ;;  %vm21_vm1 = vcmask 15360   ;;  %vm55_vm2 = vcmask 31744   ;;  %s105_s1 = inlined_call_operand.vmem [shape: f32[2,4], index: 1, kind: input, shape index: {}]   ;;  %s106_s0 = inlined_call_operand.vmem [shape: f32[16,2], index: 0, kind: input, shape index: {}]   ;;  %s107_s2 = inlined_call_operand.vmem [shape: f32[1,4], index: 2, kind: input, shape index: {}]   ;;  %s108_s3 = inlined_call_operand.vmem [shape: f32[16,4], index: 3, kind: output, shape index: {}]  }
   0x1   :  { %v16_v0 = vld [vmem:[%s105_s1] sm:$0x3]  ;;  %v15_v2 = vld [vmem:[%s106_s0 + $0x8] sm:$0xff] }
   0x2   :  { %v14_v1 = vld [vmem:[%s106_s0] sm:$0xff]  ;;  %62 = vmatpush.msk.msra.mxu0 %vm28_vm0, %v16_v0  ;;  %65 = vmatpush.msk.msra.mxu1 %vm28_vm0, %v16_v0 }
   0x3   :  { %63 = vmatmul.msk.f32.vlgmr.msra.gmra.mxu0 %vm21_vm1, %v14_v1  ;;  %64 = vmatmul.msk.f32.vlgmr.msra.gmra.mxu1 %vm21_vm1, %v15_v2  ;;  %v66_v3 = vld [vmem:[%s107_s2] ss:$0 sm:$0xff] }
  0x80   :  { %v49_v4 = vpop.f32.mrf.mxu0  ;;  %v52_v5 = vpop.f32.mrf.mxu1 }
  0x81   :  { %v50_v6 = vadd.f32 %v66_v3, %v49_v4  ;;  %v53_v7 = vadd.f32 %v66_v3, %v52_v5 }
  0x83   :  { %56 = vst.msk [vmem:[%s108_s3] sm:$0xff] %vm55_vm2, %v50_v6 }
  0x84   :  { %57 = vst.msk [vmem:[%s108_s3 + $0x8] sm:$0xff] %vm55_vm2, %v53_v7 }

</bundles_post_ra>
